<compile_context>
chip_gen: v5e
topology: v5e:2x2
jax: 0.10.0
libtpu: 0.0.40
codegen_flags: <defaults>
</compile_context>

<pallas_src>
import functools
import math

import jax
import jax.numpy as jnp
from jax.experimental import pallas as pl
from jax.experimental.pallas import tpu as pltpu


# ---------------------------------------------------------------------------
# Tile selection helpers
# ---------------------------------------------------------------------------

_ROW_TILE_CANDS = (512, 256, 128, 64, 32, 16, 8)
_K_TILE_CANDS = (2048, 1024, 512, 256, 128)
_RESIDENT_X_BYTES_CAP = 8 * 1024 * 1024   # keep x resident when N*H*2B <= 8 MiB


def _pick_row_tile(n):
    # Largest tile <= 512 that divides n, preferring >= 2 row blocks so the
    # "parallel" row axis can be sharded across TensorCores (v7x megacore).
    for c in _ROW_TILE_CANDS:
        if n % c == 0 and n // c >= 2:
            return c
    for c in _ROW_TILE_CANDS:
        if n % c == 0:
            return c
    return n  # non-multiple-of-8 N: fall back to full extent (perf cliff, still correct)


def _pick_k_tile(n):
    for c in _K_TILE_CANDS:
        if n % c == 0:
            return c
    return n  # full extent fallback (always a legal block shape)


# ---------------------------------------------------------------------------
# Pallas kernels
# ---------------------------------------------------------------------------

def _linear_kernel(x_ref, w_ref, b_ref, o_ref, *, apply_relu):
    # x_ref: (tm, Cin) bf16  w_ref: (Cin, Cout) bf16  b_ref: (1, Cout) f32
    # o_ref: (tm, Cout) f32
    y = jnp.dot(x_ref[...], w_ref[...], preferred_element_type=jnp.float32)
    y = y + b_ref[...]
    if apply_relu:
        y = jnp.maximum(y, 0.0)
    o_ref[...] = y.astype(o_ref.dtype)


def _gcn2_kernel(adj_ref, x_ref, x0_ref, w_ref, c_ref, shift_ref, o_ref, acc_ref,
                 *, alpha, tk, x_resident):
    # adj_ref: (tm, tk) bf16
    # x_ref:   (N, H) bf16 resident  OR  (tk, H) bf16 streamed
    # x0_ref:  (tm, H) f32 initial residual
    # w_ref:   (H, H) bf16 folded weight  W' = beta * W * bn_scale
    # c_ref:   (1, H) f32 folded scale    c  = (1-beta) * bn_scale
    # shift_ref: (1, H) f32 folded BN shift
    # o_ref:   (tm, H) bf16 layer output
    # acc_ref: (tm, H) f32 scratch, carried across the K grid axis.
    k = pl.program_id(1)

    @pl.when(k == 0)
    def _():
        acc_ref[...] = jnp.zeros_like(acc_ref)

    if x_resident:
        start = pl.multiple_of(k * tk, tk)
        x_blk = x_ref[pl.ds(start, tk), :]
    else:
        x_blk = x_ref[...]

    acc_ref[...] += jnp.dot(adj_ref[...], x_blk,
                            preferred_element_type=jnp.float32)

    @pl.when(k == pl.num_programs(1) - 1)
    def _():
        support = (1.0 - alpha) * acc_ref[...] + alpha * x0_ref[...]
        # Folded epilogue:  relu( support @ W' + support * c + shift )
        h = jnp.dot(support.astype(jnp.bfloat16), w_ref[...],
                    preferred_element_type=jnp.float32)
        h = h + support * c_ref[...] + shift_ref[...]
        o_ref[...] = jnp.maximum(h, 0.0).astype(o_ref.dtype)


# ---------------------------------------------------------------------------
# Pallas wrappers
# ---------------------------------------------------------------------------

def _pad_lanes(a, mult=128):
    pad = (-a.shape[-1]) % mult
    if pad:
        a = jnp.pad(a, [(0, 0)] * (a.ndim - 1) + [(0, pad)])
    return a


def linear(x, w, b, *, apply_relu):
    """y = x @ w + b, optional ReLU.  x: [N, Cin], w: [Cin, Cout], b: [Cout].

    Operands are fed to the MXU in bf16 with f32 accumulation; the output lane
    dimension is padded to a multiple of 128 (lane-dense stores) and sliced
    back afterwards.
    """
    n, cin = x.shape
    cout = w.shape[1]
    wp = _pad_lanes(w.astype(jnp.bfloat16))
    bp = _pad_lanes(b.reshape(1, cout).astype(jnp.float32))
    cout_p = wp.shape[1]
    tm = _pick_row_tile(n)

    y = pl.pallas_call(
        functools.partial(_linear_kernel, apply_relu=apply_relu),
        out_shape=jax.ShapeDtypeStruct((n, cout_p), jnp.float32),
        grid_spec=pltpu.PrefetchScalarGridSpec(
            num_scalar_prefetch=0,
            grid=(n // tm,),
            in_specs=[
                pl.BlockSpec((tm, cin), lambda i: (i, 0)),
                pl.BlockSpec((cin, cout_p), lambda i: (0, 0)),
                pl.BlockSpec((1, cout_p), lambda i: (0, 0)),
            ],
            out_specs=pl.BlockSpec((tm, cout_p), lambda i: (i, 0)),
        ),
        compiler_params=pltpu.CompilerParams(
            dimension_semantics=("parallel",),
            vmem_limit_bytes=48 * 1024 * 1024,
        ),
    )(x.astype(jnp.bfloat16), wp, bp)
    return y[:, :cout] if cout_p != cout else y


def gcn2_conv_bn_relu(adj_bf16, x_bf16, x0, w, bn_gamma, bn_beta, bn_mean, bn_var,
                      *, alpha, beta, eps=1e-5):
    """Fused GCN2Conv + eval-BatchNorm + ReLU.  Returns bf16 activations.

    adj_bf16: [N, N] bf16 (normalized, transposed adjacency)
    x_bf16:   [N, H] bf16 (previous layer activation)
    x0:       [N, H] f32 initial residual
    w:        [H, H] f32 layer weight
    """
    n, hid = x0.shape
    tm = _pick_row_tile(n)
    tk = _pick_k_tile(n)
    x_resident = (n * hid * 2) <= _RESIDENT_X_BYTES_CAP

    # Fold BN (eval mode) and beta into the weight / per-channel terms:
    #   relu( ((1-b)*s + b*(s@W)) * scale + shift )
    # = relu( s @ (b*W*scale) + s * ((1-b)*scale) + shift )
    scale = bn_gamma / jnp.sqrt(bn_var + eps)
    shift = (bn_beta - bn_mean * scale).reshape(1, hid).astype(jnp.float32)
    w_fold = (beta * w * scale[None, :]).astype(jnp.bfloat16)
    c_vec = ((1.0 - beta) * scale).reshape(1, hid).astype(jnp.float32)

    if x_resident:
        x_spec = pl.BlockSpec((n, hid), lambda i, k: (0, 0))      # VMEM-resident
        x_bytes = n * hid * 2
    else:
        x_spec = pl.BlockSpec((tk, hid), lambda i, k: (k, 0))     # streamed K tiles
        x_bytes = (n // tm) * n * hid * 2

    flops = 2 * n * n * hid + 2 * n * hid * hid
    bytes_accessed = (n * n * 2          # adjacency (bf16)
                      + x_bytes          # x (bf16)
                      + n * hid * 4      # x0 (f32)
                      + hid * hid * 2    # W (bf16)
                      + 2 * hid * 4      # folded scale/shift
                      + n * hid * 2)     # output (bf16)

    return pl.pallas_call(
        functools.partial(_gcn2_kernel, alpha=float(alpha), tk=tk,
                          x_resident=x_resident),
        out_shape=jax.ShapeDtypeStruct((n, hid), jnp.bfloat16),
        grid_spec=pltpu.PrefetchScalarGridSpec(
            num_scalar_prefetch=0,
            grid=(n // tm, n // tk),
            in_specs=[
                pl.BlockSpec((tm, tk), lambda i, k: (i, k)),       # adj_t row/K tile
                x_spec,                                            # x (resident or tiled)
                pl.BlockSpec((tm, hid), lambda i, k: (i, 0)),      # x0 row tile
                pl.BlockSpec((hid, hid), lambda i, k: (0, 0)),     # folded W (resident)
                pl.BlockSpec((1, hid), lambda i, k: (0, 0)),       # c = (1-beta)*scale
                pl.BlockSpec((1, hid), lambda i, k: (0, 0)),       # shift
            ],
            out_specs=pl.BlockSpec((tm, hid), lambda i, k: (i, 0)),
            scratch_shapes=[pltpu.VMEM((tm, hid), jnp.float32)],
        ),
        compiler_params=pltpu.CompilerParams(
            dimension_semantics=("parallel", "arbitrary"),
            vmem_limit_bytes=48 * 1024 * 1024,
        ),
        cost_estimate=pl.CostEstimate(
            flops=int(flops), transcendentals=0, bytes_accessed=int(bytes_accessed)),
    )(adj_bf16, x_bf16, x0, w_fold, c_vec, shift)


# ---------------------------------------------------------------------------
# Graph preprocessing (dense equivalent of gcn_norm + SparseTensor transpose)
# ---------------------------------------------------------------------------

def build_norm_adj_t(edge_index, n):
    row, col = edge_index
    a = jnp.zeros((n, n), jnp.float32).at[row, col].add(1.0)
    a = a + jnp.eye(n, dtype=jnp.float32)             # add self loops (weight 1)
    deg = a.sum(axis=0)                               # target-node degree
    dinv = jnp.where(deg > 0, 1.0 / jnp.sqrt(deg), 0.0)
    a_norm = dinv[:, None] * a * dinv[None, :]        # D^-1/2 (A+I) D^-1/2
    return a_norm.T                                   # SparseTensor(row=col, col=row)


# ---------------------------------------------------------------------------
# Full GCNII forward (Pallas path) and pure-JAX reference
# ---------------------------------------------------------------------------

def gcnii_forward(params, x, edge_index, *, alpha, theta):
    n = x.shape[0]
    adj_bf16 = build_norm_adj_t(edge_index, n).astype(jnp.bfloat16)

    x = linear(x, params["lin0_w"], params["lin0_b"], apply_relu=True)   # f32
    x0 = x
    x = x.astype(jnp.bfloat16)   # one-time cast; conv layers emit bf16 directly
    for i, lp in enumerate(params["convs"]):
        beta = math.log(theta / (i + 1) + 1.0)
        x = gcn2_conv_bn_relu(adj_bf16, x, x0, lp["weight"],
                              lp["bn_gamma"], lp["bn_beta"], lp["bn_mean"], lp["bn_var"],
                              alpha=alpha, beta=beta)
    return linear(x, params["lin1_w"], params["lin1_b"], apply_relu=False)


def gcnii_reference(params, x, edge_index, *, alpha, theta):
    """Plain-JAX reference with the same bf16 casts / BN folding mirrored."""
    hp = jax.lax.Precision.HIGHEST
    b2f = lambda a: a.astype(jnp.bfloat16).astype(jnp.float32)
    n = x.shape[0]
    adj = b2f(build_norm_adj_t(edge_index, n))

    x = jnp.maximum(
        jnp.dot(b2f(x), b2f(params["lin0_w"]), precision=hp) + params["lin0_b"], 0.0)
    x0 = x
    x = b2f(x)
    for i, lp in enumerate(params["convs"]):
        beta = math.log(theta / (i + 1) + 1.0)
        scale = lp["bn_gamma"] / jnp.sqrt(lp["bn_var"] + 1e-5)
        shift = lp["bn_beta"] - lp["bn_mean"] * scale
        w_fold = b2f(beta * lp["weight"] * scale[None, :])
        c = (1.0 - beta) * scale
        agg = jnp.dot(adj, x, precision=hp)
        support = (1.0 - alpha) * agg + alpha * x0
        h = jnp.dot(b2f(support), w_fold, precision=hp) + support * c + shift
        x = b2f(jnp.maximum(h, 0.0))                 # mirror bf16 layer output
    return jnp.dot(x, b2f(params["lin1_w"]), precision=hp) + params["lin1_b"]


def init_params(key, in_c, hid, out_c, num_layers):
    keys = jax.random.split(key, 4 + 5 * num_layers)
    params = {
        "lin0_w": jax.random.normal(keys[0], (in_c, hid), jnp.float32) / math.sqrt(in_c),
        "lin0_b": 0.1 * jax.random.normal(keys[1], (hid,), jnp.float32),
        "lin1_w": jax.random.normal(keys[2], (hid, out_c), jnp.float32) / math.sqrt(hid),
        "lin1_b": 0.1 * jax.random.normal(keys[3], (out_c,), jnp.float32),
        "convs": [],
    }
    for l in range(num_layers):
        k = keys[4 + 5 * l: 9 + 5 * l]
        params["convs"].append({
            "weight": jax.random.normal(k[0], (hid, hid), jnp.float32) / math.sqrt(hid),
            "bn_gamma": 1.0 + 0.1 * jax.random.normal(k[1], (hid,), jnp.float32),
            "bn_beta": 0.1 * jax.random.normal(k[2], (hid,), jnp.float32),
            "bn_mean": 0.1 * jax.random.normal(k[3], (hid,), jnp.float32),
            "bn_var": 1.0 + 0.1 * jnp.abs(jax.random.normal(k[4], (hid,), jnp.float32)),
        })
    return params


if __name__ == "__main__":
    key = jax.random.PRNGKey(0)
    k_feat, k_e1, k_e2, k_par = jax.random.split(key, 4)

    # Small graph: 1024 nodes, 64 input features, hidden=128 (lane-aligned),
    # 16 output classes, 2 GCN2Conv layers.
    N, IN_C, HID, OUT_C = 1024, 64, 128, 16
    NUM_LAYERS, ALPHA, THETA = 2, 0.1, 0.5

    x = jax.random.normal(k_feat, (N, IN_C), jnp.float32)

    E = 8 * N
    src = jax.random.randint(k_e1, (E,), 0, N)
    dst = jax.random.randint(k_e2, (E,), 0, N)
    edge_index = jnp.stack([jnp.concatenate([src, dst]),
                            jnp.concatenate([dst, src])])   # undirected

    params = init_params(k_par, IN_C, HID, OUT_C, NUM_LAYERS)

    out = jax.block_until_ready(
        gcnii_forward(params, x, edge_index, alpha=ALPHA, theta=THETA))
    ref = jax.block_until_ready(
        gcnii_reference(params, x, edge_index, alpha=ALPHA, theta=THETA))

    assert out.shape == (N, OUT_C)
    # Tolerance is bf16-level: both paths apply identical bf16 casts / folding,
    # residual differences come only from f32 accumulation order.
    max_err = float(jnp.max(jnp.abs(out - ref)))
    assert jnp.allclose(out, ref, atol=2e-2, rtol=2e-2), f"max_abs_err={max_err}"

    print("KERNEL_OK")
</pallas_src>

<mosaic_0001>
module attributes {stable_mosaic.version = 11 : i64} {
  func.func @_linear_kernel(%arg0: i32, %arg1: memref<512x64xbf16, #tpu.memory_space<vmem>>, %arg2: memref<64x128xbf16, #tpu.memory_space<vmem>>, %arg3: memref<1x128xf32, #tpu.memory_space<vmem>>, %arg4: memref<512x128xf32, #tpu.memory_space<vmem>>) attributes {dimension_semantics = [#tpu.dimension_semantics<parallel>], iteration_bounds = array<i64: 2>, scalar_prefetch = 0 : i64, scratch_operands = 0 : i64, tpu.core_type = #tpu.core_type<tc>, window_params = [{transform_indices = @transform_0, window_bounds = array<i64: 512, 64>}, {pipeline_mode = #tpu.pipeline_mode<synchronous>, transform_indices = @transform_1, window_bounds = array<i64: 64, 128>}, {pipeline_mode = #tpu.pipeline_mode<synchronous>, transform_indices = @transform_2, window_bounds = array<i64: 1, 128>}, {transform_indices = @transform_3, window_bounds = array<i64: 512, 128>}]} {
    %c0 = arith.constant 0 : index
    %c0_0 = arith.constant 0 : index
    %0 = vector.load %arg1[%c0, %c0_0] : memref<512x64xbf16, #tpu.memory_space<vmem>>, vector<512x64xbf16>
    %c0_1 = arith.constant 0 : index
    %c0_2 = arith.constant 0 : index
    %1 = vector.load %arg2[%c0_1, %c0_2] : memref<64x128xbf16, #tpu.memory_space<vmem>>, vector<64x128xbf16>
    %cst = arith.constant dense<0.000000e+00> : vector<512x128xf32>
    %2 = tpu.matmul %0, %1, %cst {dimension_numbers = #tpu.dot_dimension_numbers<[1], [0], [0], [1], [0, 0, 1, 1], [], []>} : vector<512x64xbf16>, vector<64x128xbf16>, vector<512x128xf32> -> vector<512x128xf32>
    %c0_3 = arith.constant 0 : index
    %c0_4 = arith.constant 0 : index
    %3 = vector.load %arg3[%c0_3, %c0_4] : memref<1x128xf32, #tpu.memory_space<vmem>>, vector<1x128xf32>
    %4 = vector.broadcast %3 : vector<1x128xf32> to vector<512x128xf32>
    %5 = arith.addf %2, %4 : vector<512x128xf32>
    %cst_5 = arith.constant 0.000000e+00 : f32
    %6 = vector.broadcast %cst_5 : f32 to vector<512x128xf32>
    %7 = arith.maximumf %5, %6 : vector<512x128xf32>
    %c0_6 = arith.constant 0 : index
    %c0_7 = arith.constant 0 : index
    %8 = vector.load %arg4[%c0_6, %c0_7] : memref<512x128xf32, #tpu.memory_space<vmem>>, vector<512x128xf32>
    tpu.vector_store %arg4[%c0_6, %c0_7], %7 {strides = array<i32>} : memref<512x128xf32, #tpu.memory_space<vmem>>, vector<512x128xf32>,
    return
  }
  func.func @transform_0(%arg0: i32) -> (i32, i32) {
    %c0_i32 = arith.constant 0 : i32
    %c0_i32_0 = arith.constant 0 : i32
    return %arg0, %c0_i32 : i32, i32
  }
  func.func @transform_1(%arg0: i32) -> (i32, i32) {
    %c0_i32 = arith.constant 0 : i32
    %c0_i32_0 = arith.constant 0 : i32
    %c0_i32_1 = arith.constant 0 : i32
    return %c0_i32, %c0_i32_0 : i32, i32
  }
  func.func @transform_2(%arg0: i32) -> (i32, i32) {
    %c0_i32 = arith.constant 0 : i32
    %c0_i32_0 = arith.constant 0 : i32
    %c0_i32_1 = arith.constant 0 : i32
    return %c0_i32, %c0_i32_0 : i32, i32
  }
  func.func @transform_3(%arg0: i32) -> (i32, i32) {
    %c0_i32 = arith.constant 0 : i32
    %c0_i32_0 = arith.constant 0 : i32
    return %arg0, %c0_i32 : i32, i32
  }
}

</mosaic_0001>

<bundles_post_ra>
// kernel: tpu_custom_call.1
= control target key start
LH: loop header
LB: loop body
LE: loop exit
PB: predicated region body
PF: predicated region fallthrough
CT: control target
= control target key end

     0   :  { %8 = vsyncpa [#allocation3], 0  ;;  %s1572_s0 = inlined_call_operand.vmem [shape: bf16[1024,64], index: 0, kind: input, shape index: {}]   ;;  %s1573_s1 = inlined_call_operand.vmem [shape: bf16[64,128], index: 1, kind: input, shape index: {}]   ;;  %s1574_s2 = inlined_call_operand.vmem [shape: f32[1,128], index: 2, kind: input, shape index: {}]   ;;  %s1575_s3 = inlined_call_operand.hbm [shape: f32[1024,128], index: 3, kind: output, shape index: {}]  }
   0x1   :  { %10 = vsyncpa [#allocation3 + $0x1], 0  ;;  %s1270_s12 = smov 0   ;;  %s1272_s13 = smov 0  }
   0x2   :  { %s1274_s14 = smov 0   ;;  %s1276_s15 = smov 0  }
   0x3 LB: > { %s1291_s16 = sadd.s32 4294967295, %s1246_s15   ;;  %s905_s17 = sadd.s32 4294967294, %s1246_s15   ;;  %s1246_s15 = sphi %s1276_s15, %s1581_s15   ;;  %s1242_s14 = sphi %s1274_s14, %s1580_s14   ;;  %s1238_s13 = sphi %s1272_s13, %s1579_s13   ;;  %s1234_s12 = sphi %s1270_s12, %s1578_s12  }
   0x4   : > { %s1295_s18 = sadd.s32 1, %s1246_s15   ;;  %s91_s19 = sadd.s32 1, %s1242_s14 }
   0x5   : > { %s88_s20 = ssub.s32 %s1246_s15, %s1295_s18  ;;  %p101_p0 = scmp.ne.s32.totalorder %s1242_s14, %s1238_s13 }
   0x6   : > { %p89_p1 = scmp.eq.s32.totalorder %s88_s20, 0  ;;  %p102_p2 = scmp.eq.s32.totalorder %s1291_s16, 1 }
   0x7   : > { %p107_p3 = scmp.ne.s32.totalorder %s1238_s13, %s1234_s12  ;;  %p108_p4 = scmp.eq.s32.totalorder %s905_s17, 1 }
   0x8   : > { %s1306_s21 = scalar_select %p89_p1, %s1242_s14, %s91_s19  }
   0x9   : > { %p1308_p5 = por %p102_p2, %p101_p0  ;;  %p1312_p6 = por %p108_p4, %p107_p3 }
   0xa   : > { %p908_p7 = scmp.ge.s32.totalorder %s1246_s15, 1  ;;  %p141_p8 = scmp.lt.s32.totalorder %s1246_s15, 3 }
   0xc   : > { %p142_p9 = pnand %p908_p7, %p141_p8 }
   0xd   : > { %s910_s26 = sshll.u32 (!%p142_p9), %s1291_s16, 6  ;;  %s162_s10 = sand.u32 (!%p142_p9), 1, %s1238_s13  }
   0xe   : > { %145 = sbr.rel (%p142_p9) target bundleno = 297 (0x129), region = 32  ;;  %p166_p10 = scmp.lt.s32.totalorder (!%p142_p9), %s910_s26, 127 }
   0xf   : > { %s909_s19 = sshll.u32 (!%p142_p9), %s162_s10, 9  ;;  %s1129_s24 = sshll.u32 (!%p142_p9), %s1291_s16, 9 }
  0x10   : > { %s1410_s20 = scalar_lea.vmem (!%p142_p9), [#allocation2], %s909_s19  ;;  %s839_s27 = scalar_lea.hbm (!%p142_p9), %s1575_s3, %s1129_s24 }
  0x11   : > { %s840_s28 = sshll.u32 (!%p142_p9), %s1410_s20, 4  ;;  %s842_s16 = sshll.u32 (!%p142_p9), %s839_s27, 4  ;;  %s841_s28 = int_to_ptr.vmem [resolvable:$true] %s840_s28  ;;  %s843_s16 = int_to_ptr.hbm [resolvable:$true] %s842_s16 }
  0x12   : > { %s828_s29 = scalar_lea.sflag (!%p142_p9), [#allocation3], %s162_s10  ;;  %s1198_s30 = sshra.s32 (!%p142_p9), %s843_s16, 4  ;;  %s1199_s30 = int_to_ptr.hbm [resolvable:$true] %s1198_s30 }
  0x13   : > { %v1128_v0 = vld [vmem:[%s1573_s1 + $0x18] sm:$0xff]  ;;  %v1127_v1 = vld [vmem:[%s1573_s1 + $0x10] sm:$0xff]  ;;  %s1583_s26 = smov (!%p166_p10, %s910_s26), 127  ;;  %v1126_v2 = vld [vmem:[%s1573_s1 + $0x8] sm:$0xff]  ;;  %vm433_vm0 = vcmask 523264   ;;  %s1204_s7 = scalar_lea.hbm %s1575_s3, 1024 }
  0x14   : > { %534 = vmatpush.bf16.msra.mxu0 %v1128_v0  ;;  %1130 = vmatpush.bf16.msra.mxu1 %v1128_v0  ;;  %s911_s4 = sshll.u32 %s1583_s26, 2  ;;  %v1125_v3 = vld [vmem:[%s1573_s1] sm:$0xff]  ;;  %p1205_p0 = scmp.lt.s32.totalorder %s1199_s30, %s1575_s3 }
  0x15   : > { %1131 = vmatpush.bf16.msra.mxu2 %v1128_v0  ;;  %1132 = vmatpush.bf16.msra.mxu3 %v1128_v0  ;;  %s1334_s9 = scalar_lea.vmem %s1572_s0, %s911_s4  ;;  %v1404_v36 = vld [vmem:[%s1574_s2] ss:$0 sm:$0xff]  ;;  %s1200_s4 = scalar_lea.hbm %s1199_s30, 512 }
  0x16   : > { %v1093_v4 = vld [vmem:[%s1334_s9] sm:$0xff]  ;;  %v1094_v8 = vld [vmem:[%s1334_s9 + $0x8] sm:$0xff]  ;;  %v1095_v12 = vld [vmem:[%s1334_s9 + $0x10] sm:$0xff]  ;;  %p1201_p11 = scmp.ne.s32.totalorder %s1199_s30, %s1200_s4  ;;  %p1206_p1 = scmp.lt.s32.totalorder %s1204_s7, %s1200_s4 }
  0x17   : > { %v1101_v5 = vld [vmem:[%s1334_s9 + $0x40] sm:$0xff]  ;;  %v1102_v9 = vld [vmem:[%s1334_s9 + $0x48] sm:$0xff]  ;;  %v1103_v13 = vld [vmem:[%s1334_s9 + $0x50] sm:$0xff] }
  0x18   : > { %535 = vmatpush.bf16.msra.mxu0 %v1127_v1  ;;  %1133 = vmatpush.bf16.msra.mxu1 %v1127_v1  ;;  %v1109_v6 = vld [vmem:[%s1334_s9 + $0x80] sm:$0xff]  ;;  %v1110_v10 = vld [vmem:[%s1334_s9 + $0x88] sm:$0xff]  ;;  %v1111_v14 = vld [vmem:[%s1334_s9 + $0x90] sm:$0xff]  ;;  %p1202_p12 = pnand %p1201_p11, %p1308_p5  ;;  %p1207_p2 = por %p1206_p1, %p1205_p0 }
  0x19   : > { %1134 = vmatpush.bf16.msra.mxu2 %v1127_v1  ;;  %1135 = vmatpush.bf16.msra.mxu3 %v1127_v1  ;;  %v1117_v7 = vld [vmem:[%s1334_s9 + $0xc0] sm:$0xff]  ;;  %v1118_v11 = vld [vmem:[%s1334_s9 + $0xc8] sm:$0xff]  ;;  %v1119_v15 = vld [vmem:[%s1334_s9 + $0xd0] sm:$0xff] }
  0x1a   : > { %v1096_v16 = vld [vmem:[%s1334_s9 + $0x18] sm:$0xff]  ;;  %v1097_v20 = vld [vmem:[%s1334_s9 + $0x20] sm:$0xff]  ;;  %v1098_v24 = vld [vmem:[%s1334_s9 + $0x28] sm:$0xff]  ;;  %p1203_p13 = pneg %p1202_p12 }
  0x1b   : > { %v1104_v17 = vld [vmem:[%s1334_s9 + $0x58] sm:$0xff]  ;;  %v1105_v21 = vld [vmem:[%s1334_s9 + $0x60] sm:$0xff]  ;;  %v1106_v25 = vld [vmem:[%s1334_s9 + $0x68] sm:$0xff] }
  0x1c   : > { %536 = vmatpush.bf16.msra.mxu0 %v1126_v2  ;;  %1136 = vmatpush.bf16.msra.mxu1 %v1126_v2  ;;  %v1112_v18 = vld [vmem:[%s1334_s9 + $0x98] sm:$0xff]  ;;  %v1113_v22 = vld [vmem:[%s1334_s9 + $0xa0] sm:$0xff]  ;;  %v1114_v26 = vld [vmem:[%s1334_s9 + $0xa8] sm:$0xff]  ;;  %p1208_p3 = pnand %p1207_p2, %p1203_p13 }
  0x1d   : > { %1137 = vmatpush.bf16.msra.mxu2 %v1126_v2  ;;  %1138 = vmatpush.bf16.msra.mxu3 %v1126_v2  ;;  %v1120_v19 = vld [vmem:[%s1334_s9 + $0xd8] sm:$0xff]  ;;  %v1121_v23 = vld [vmem:[%s1334_s9 + $0xe0] sm:$0xff]  ;;  %v1122_v27 = vld [vmem:[%s1334_s9 + $0xe8] sm:$0xff] }
  0x1e   : > { %v1099_v28 = vld [vmem:[%s1334_s9 + $0x30] sm:$0xff]  ;;  %v1100_v32 = vld [vmem:[%s1334_s9 + $0x38] sm:$0xff] }
  0x1f   : > { %v1107_v29 = vld [vmem:[%s1334_s9 + $0x70] sm:$0xff]  ;;  %v1108_v33 = vld [vmem:[%s1334_s9 + $0x78] sm:$0xff] }
  0x20   : > { %537 = vmatpush.bf16.msra.mxu0 %v1125_v3  ;;  %1139 = vmatpush.bf16.msra.mxu1 %v1125_v3  ;;  %v1115_v30 = vld [vmem:[%s1334_s9 + $0xb0] sm:$0xff]  ;;  %v1116_v34 = vld [vmem:[%s1334_s9 + $0xb8] sm:$0xff] }
  0x21   : > { %1140 = vmatpush.bf16.msra.mxu2 %v1125_v3  ;;  %1141 = vmatpush.bf16.msra.mxu3 %v1125_v3  ;;  %v1123_v31 = vld [vmem:[%s1334_s9 + $0xf0] sm:$0xff]  ;;  %v1124_v35 = vld [vmem:[%s1334_s9 + $0xf8] sm:$0xff] }
  0x23   : > { %1056 = vmatmul.msk.bf16.vlgmr.msra.gmra.mxu0 %vm433_vm0, %v1093_v4  ;;  %1064 = vmatmul.msk.bf16.vlgmr.msra.gmra.mxu1 %vm433_vm0, %v1101_v5 }
  0x24   : > { %1072 = vmatmul.msk.bf16.vlgmr.msra.gmra.mxu2 %vm433_vm0, %v1109_v6  ;;  %1080 = vmatmul.msk.bf16.vlgmr.msra.gmra.mxu3 %vm433_vm0, %v1117_v7 }
  0x33   : > { %1057 = vmatmul.msk.bf16.gmra.mxu0 %vm433_vm0, %v1094_v8  ;;  %1065 = vmatmul.msk.bf16.gmra.mxu1 %vm433_vm0, %v1102_v9 }
  0x34   : > { %1073 = vmatmul.msk.bf16.gmra.mxu2 %vm433_vm0, %v1110_v10  ;;  %1081 = vmatmul.msk.bf16.gmra.mxu3 %vm433_vm0, %v1118_v11 }
  0x43   : > { %1058 = vmatmul.msk.bf16.gmra.mxu0 %vm433_vm0, %v1095_v12  ;;  %1066 = vmatmul.msk.bf16.gmra.mxu1 %vm433_vm0, %v1103_v13 }
  0x44   : > { %1074 = vmatmul.msk.bf16.gmra.mxu2 %vm433_vm0, %v1111_v14  ;;  %1082 = vmatmul.msk.bf16.gmra.mxu3 %vm433_vm0, %v1119_v15 }
  0x53   : > { %1059 = vmatmul.msk.bf16.gmra.mxu0 %vm433_vm0, %v1096_v16  ;;  %1067 = vmatmul.msk.bf16.gmra.mxu1 %vm433_vm0, %v1104_v17 }
  0x54   : > { %1075 = vmatmul.msk.bf16.gmra.mxu2 %vm433_vm0, %v1112_v18  ;;  %1083 = vmatmul.msk.bf16.gmra.mxu3 %vm433_vm0, %v1120_v19 }
  0x63   : > { %1060 = vmatmul.msk.bf16.gmra.mxu0 %vm433_vm0, %v1097_v20  ;;  %1068 = vmatmul.msk.bf16.gmra.mxu1 %vm433_vm0, %v1105_v21 }
  0x64   : > { %1076 = vmatmul.msk.bf16.gmra.mxu2 %vm433_vm0, %v1113_v22  ;;  %1084 = vmatmul.msk.bf16.gmra.mxu3 %vm433_vm0, %v1121_v23 }
  0x73   : > { %1061 = vmatmul.msk.bf16.gmra.mxu0 %vm433_vm0, %v1098_v24  ;;  %1069 = vmatmul.msk.bf16.gmra.mxu1 %vm433_vm0, %v1106_v25 }
  0x74   : > { %1077 = vmatmul.msk.bf16.gmra.mxu2 %vm433_vm0, %v1114_v26  ;;  %1085 = vmatmul.msk.bf16.gmra.mxu3 %vm433_vm0, %v1122_v27 }
  0x83   : > { %1062 = vmatmul.msk.bf16.gmra.mxu0 %vm433_vm0, %v1099_v28  ;;  %1070 = vmatmul.msk.bf16.gmra.mxu1 %vm433_vm0, %v1107_v29 }
  0x84   : > { %1078 = vmatmul.msk.bf16.gmra.mxu2 %vm433_vm0, %v1115_v30  ;;  %1086 = vmatmul.msk.bf16.gmra.mxu3 %vm433_vm0, %v1123_v31 }
  0x93   : > { %1063 = vmatmul.msk.bf16.gmra.mxu0 %vm433_vm0, %v1100_v32  ;;  %1071 = vmatmul.msk.bf16.gmra.mxu1 %vm433_vm0, %v1108_v33 }
  0x94   : > { %1079 = vmatmul.msk.bf16.gmra.mxu2 %vm433_vm0, %v1116_v34  ;;  %1087 = vmatmul.msk.bf16.gmra.mxu3 %vm433_vm0, %v1124_v35 }
  0xa0   : > { %v539_v37 = vpop.f32.mrf.mxu0  ;;  %v579_v38 = vpop.f32.mrf.mxu1 }
  0xa1   : > { %v540_v39 = vadd.f32 %v1404_v36, %v539_v37  ;;  %v580_v40 = vadd.f32 %v1404_v36, %v579_v38 }
  0xa3   : > { %v699_v41 = vmax.f32 %v540_v39, 0.0  ;;  %v715_v42 = vmax.f32 %v580_v40, 0.0 }
  0xa5   : > { %763 = vst [vmem:[%s1410_s20] sm:$0xff] %v699_v41 }
  0xa6   : > { %779 = vst [vmem:[%s1410_s20 + $0x80] sm:$0xff] %v715_v42 }
  0xa7   : > { %v619_v43 = vpop.f32.mrf.mxu2  ;;  %v659_v44 = vpop.f32.mrf.mxu3 }
  0xa8   : > { %v620_v45 = vadd.f32 %v1404_v36, %v619_v43  ;;  %v660_v46 = vadd.f32 %v1404_v36, %v659_v44  ;;  %v541_v47 = vpop.f32.mrf.mxu0  ;;  %v581_v48 = vpop.f32.mrf.mxu1 }
  0xa9   : > { %v542_v49 = vadd.f32 %v1404_v36, %v541_v47  ;;  %v582_v50 = vadd.f32 %v1404_v36, %v581_v48 }
  0xaa   : > { %v731_v51 = vmax.f32 %v620_v45, 0.0  ;;  %v747_v52 = vmax.f32 %v660_v46, 0.0 }
  0xab   : > { %v700_v53 = vmax.f32 %v542_v49, 0.0  ;;  %v716_v54 = vmax.f32 %v582_v50, 0.0 }
  0xac   : > { %795 = vst [vmem:[%s1410_s20 + $0x100] sm:$0xff] %v731_v51 }
  0xad   : > { %811 = vst [vmem:[%s1410_s20 + $0x180] sm:$0xff] %v747_v52 }
  0xae   : > { %764 = vst [vmem:[%s1410_s20 + $0x8] sm:$0xff] %v700_v53 }
  0xaf   : > { %780 = vst [vmem:[%s1410_s20 + $0x88] sm:$0xff] %v716_v54  ;;  %v621_v55 = vpop.f32.mrf.mxu2  ;;  %v661_v56 = vpop.f32.mrf.mxu3 }
  0xb0   : > { %v622_v57 = vadd.f32 %v1404_v36, %v621_v55  ;;  %v662_v58 = vadd.f32 %v1404_v36, %v661_v56  ;;  %v544_v59 = vpop.f32.mrf.mxu0  ;;  %v584_v60 = vpop.f32.mrf.mxu1 }
  0xb1   : > { %v545_v61 = vadd.f32 %v1404_v36, %v544_v59  ;;  %v585_v62 = vadd.f32 %v1404_v36, %v584_v60 }
  0xb2   : > { %v732_v63 = vmax.f32 %v622_v57, 0.0  ;;  %v748_v0 = vmax.f32 %v662_v58, 0.0 }
  0xb3   : > { %v701_v1 = vmax.f32 %v545_v61, 0.0  ;;  %v717_v2 = vmax.f32 %v585_v62, 0.0 }
  0xb4   : > { %796 = vst [vmem:[%s1410_s20 + $0x108] sm:$0xff] %v732_v63 }
  0xb5   : > { %812 = vst [vmem:[%s1410_s20 + $0x188] sm:$0xff] %v748_v0 }
  0xb6   : > { %765 = vst [vmem:[%s1410_s20 + $0x10] sm:$0xff] %v701_v1 }
  0xb7   : > { %781 = vst [vmem:[%s1410_s20 + $0x90] sm:$0xff] %v717_v2  ;;  %v624_v3 = vpop.f32.mrf.mxu2  ;;  %v664_v4 = vpop.f32.mrf.mxu3 }
  0xb8   : > { %v625_v5 = vadd.f32 %v1404_v36, %v624_v3  ;;  %v665_v6 = vadd.f32 %v1404_v36, %v664_v4  ;;  %v546_v7 = vpop.f32.mrf.mxu0  ;;  %v586_v8 = vpop.f32.mrf.mxu1 }
  0xb9   : > { %v547_v9 = vadd.f32 %v1404_v36, %v546_v7  ;;  %v587_v10 = vadd.f32 %v1404_v36, %v586_v8 }
  0xba   : > { %v733_v11 = vmax.f32 %v625_v5, 0.0  ;;  %v749_v12 = vmax.f32 %v665_v6, 0.0 }
  0xbb   : > { %v702_v13 = vmax.f32 %v547_v9, 0.0  ;;  %v718_v14 = vmax.f32 %v587_v10, 0.0 }
  0xbc   : > { %797 = vst [vmem:[%s1410_s20 + $0x110] sm:$0xff] %v733_v11 }
  0xbd   : > { %813 = vst [vmem:[%s1410_s20 + $0x190] sm:$0xff] %v749_v12 }
  0xbe   : > { %766 = vst [vmem:[%s1410_s20 + $0x18] sm:$0xff] %v702_v13 }
  0xbf   : > { %782 = vst [vmem:[%s1410_s20 + $0x98] sm:$0xff] %v718_v14  ;;  %v626_v15 = vpop.f32.mrf.mxu2  ;;  %v666_v16 = vpop.f32.mrf.mxu3 }
  0xc0   : > { %v627_v17 = vadd.f32 %v1404_v36, %v626_v15  ;;  %v667_v18 = vadd.f32 %v1404_v36, %v666_v16  ;;  %v549_v19 = vpop.f32.mrf.mxu0  ;;  %v589_v20 = vpop.f32.mrf.mxu1 }
  0xc1   : > { %v550_v21 = vadd.f32 %v1404_v36, %v549_v19  ;;  %v590_v22 = vadd.f32 %v1404_v36, %v589_v20 }
  0xc2   : > { %v734_v23 = vmax.f32 %v627_v17, 0.0  ;;  %v750_v24 = vmax.f32 %v667_v18, 0.0 }
  0xc3   : > { %v703_v25 = vmax.f32 %v550_v21, 0.0  ;;  %v719_v26 = vmax.f32 %v590_v22, 0.0 }
  0xc4   : > { %798 = vst [vmem:[%s1410_s20 + $0x118] sm:$0xff] %v734_v23 }
  0xc5   : > { %814 = vst [vmem:[%s1410_s20 + $0x198] sm:$0xff] %v750_v24 }
  0xc6   : > { %767 = vst [vmem:[%s1410_s20 + $0x20] sm:$0xff] %v703_v25 }
  0xc7   : > { %783 = vst [vmem:[%s1410_s20 + $0xa0] sm:$0xff] %v719_v26  ;;  %v629_v27 = vpop.f32.mrf.mxu2  ;;  %v669_v28 = vpop.f32.mrf.mxu3 }
  0xc8   : > { %v630_v29 = vadd.f32 %v1404_v36, %v629_v27  ;;  %v670_v30 = vadd.f32 %v1404_v36, %v669_v28  ;;  %v551_v31 = vpop.f32.mrf.mxu0  ;;  %v591_v32 = vpop.f32.mrf.mxu1 }
  0xc9   : > { %v552_v33 = vadd.f32 %v1404_v36, %v551_v31  ;;  %v592_v34 = vadd.f32 %v1404_v36, %v591_v32 }
  0xca   : > { %v735_v35 = vmax.f32 %v630_v29, 0.0  ;;  %v751_v37 = vmax.f32 %v670_v30, 0.0 }
  0xcb   : > { %v704_v38 = vmax.f32 %v552_v33, 0.0  ;;  %v720_v39 = vmax.f32 %v592_v34, 0.0 }
  0xcc   : > { %799 = vst [vmem:[%s1410_s20 + $0x120] sm:$0xff] %v735_v35 }
  0xcd   : > { %815 = vst [vmem:[%s1410_s20 + $0x1a0] sm:$0xff] %v751_v37 }
  0xce   : > { %768 = vst [vmem:[%s1410_s20 + $0x28] sm:$0xff] %v704_v38 }
  0xcf   : > { %784 = vst [vmem:[%s1410_s20 + $0xa8] sm:$0xff] %v720_v39  ;;  %v631_v40 = vpop.f32.mrf.mxu2  ;;  %v671_v41 = vpop.f32.mrf.mxu3 }
  0xd0   : > { %v632_v42 = vadd.f32 %v1404_v36, %v631_v40  ;;  %v672_v43 = vadd.f32 %v1404_v36, %v671_v41  ;;  %v554_v44 = vpop.f32.mrf.mxu0  ;;  %v594_v45 = vpop.f32.mrf.mxu1 }
  0xd1   : > { %v555_v46 = vadd.f32 %v1404_v36, %v554_v44  ;;  %v595_v47 = vadd.f32 %v1404_v36, %v594_v45 }
  0xd2   : > { %v736_v48 = vmax.f32 %v632_v42, 0.0  ;;  %v752_v49 = vmax.f32 %v672_v43, 0.0 }
  0xd3   : > { %v705_v50 = vmax.f32 %v555_v46, 0.0  ;;  %v721_v51 = vmax.f32 %v595_v47, 0.0 }
  0xd4   : > { %800 = vst [vmem:[%s1410_s20 + $0x128] sm:$0xff] %v736_v48 }
  0xd5   : > { %816 = vst [vmem:[%s1410_s20 + $0x1a8] sm:$0xff] %v752_v49 }
  0xd6   : > { %769 = vst [vmem:[%s1410_s20 + $0x30] sm:$0xff] %v705_v50 }
  0xd7   : > { %785 = vst [vmem:[%s1410_s20 + $0xb0] sm:$0xff] %v721_v51  ;;  %v634_v52 = vpop.f32.mrf.mxu2  ;;  %v674_v53 = vpop.f32.mrf.mxu3 }
  0xd8   : > { %v635_v54 = vadd.f32 %v1404_v36, %v634_v52  ;;  %v675_v55 = vadd.f32 %v1404_v36, %v674_v53  ;;  %v556_v56 = vpop.f32.mrf.mxu0  ;;  %v596_v57 = vpop.f32.mrf.mxu1 }
  0xd9   : > { %v557_v58 = vadd.f32 %v1404_v36, %v556_v56  ;;  %v597_v59 = vadd.f32 %v1404_v36, %v596_v57 }
  0xda   : > { %v737_v60 = vmax.f32 %v635_v54, 0.0  ;;  %v753_v61 = vmax.f32 %v675_v55, 0.0 }
  0xdb   : > { %v706_v62 = vmax.f32 %v557_v58, 0.0  ;;  %v722_v63 = vmax.f32 %v597_v59, 0.0 }
  0xdc   : > { %801 = vst [vmem:[%s1410_s20 + $0x130] sm:$0xff] %v737_v60 }
  0xdd   : > { %817 = vst [vmem:[%s1410_s20 + $0x1b0] sm:$0xff] %v753_v61 }
  0xde   : > { %770 = vst [vmem:[%s1410_s20 + $0x38] sm:$0xff] %v706_v62 }
  0xdf   : > { %786 = vst [vmem:[%s1410_s20 + $0xb8] sm:$0xff] %v722_v63  ;;  %v636_v0 = vpop.f32.mrf.mxu2  ;;  %v676_v1 = vpop.f32.mrf.mxu3 }
  0xe0   : > { %v637_v2 = vadd.f32 %v1404_v36, %v636_v0  ;;  %v677_v3 = vadd.f32 %v1404_v36, %v676_v1  ;;  %v559_v4 = vpop.f32.mrf.mxu0  ;;  %v599_v5 = vpop.f32.mrf.mxu1 }
  0xe1   : > { %v560_v6 = vadd.f32 %v1404_v36, %v559_v4  ;;  %v600_v7 = vadd.f32 %v1404_v36, %v599_v5 }
  0xe2   : > { %v738_v8 = vmax.f32 %v637_v2, 0.0  ;;  %v754_v9 = vmax.f32 %v677_v3, 0.0 }
  0xe3   : > { %v707_v10 = vmax.f32 %v560_v6, 0.0  ;;  %v723_v11 = vmax.f32 %v600_v7, 0.0 }
  0xe4   : > { %802 = vst [vmem:[%s1410_s20 + $0x138] sm:$0xff] %v738_v8 }
  0xe5   : > { %818 = vst [vmem:[%s1410_s20 + $0x1b8] sm:$0xff] %v754_v9 }
  0xe6   : > { %771 = vst [vmem:[%s1410_s20 + $0x40] sm:$0xff] %v707_v10 }
  0xe7   : > { %787 = vst [vmem:[%s1410_s20 + $0xc0] sm:$0xff] %v723_v11  ;;  %v639_v12 = vpop.f32.mrf.mxu2  ;;  %v679_v13 = vpop.f32.mrf.mxu3 }
  0xe8   : > { %v640_v14 = vadd.f32 %v1404_v36, %v639_v12  ;;  %v680_v15 = vadd.f32 %v1404_v36, %v679_v13  ;;  %v561_v16 = vpop.f32.mrf.mxu0  ;;  %v601_v17 = vpop.f32.mrf.mxu1 }
  0xe9   : > { %v562_v18 = vadd.f32 %v1404_v36, %v561_v16  ;;  %v602_v19 = vadd.f32 %v1404_v36, %v601_v17 }
  0xea   : > { %v739_v20 = vmax.f32 %v640_v14, 0.0  ;;  %v755_v21 = vmax.f32 %v680_v15, 0.0 }
  0xeb   : > { %v708_v22 = vmax.f32 %v562_v18, 0.0  ;;  %v724_v23 = vmax.f32 %v602_v19, 0.0 }
  0xec   : > { %803 = vst [vmem:[%s1410_s20 + $0x140] sm:$0xff] %v739_v20 }
  0xed   : > { %819 = vst [vmem:[%s1410_s20 + $0x1c0] sm:$0xff] %v755_v21 }
  0xee   : > { %772 = vst [vmem:[%s1410_s20 + $0x48] sm:$0xff] %v708_v22 }
  0xef   : > { %788 = vst [vmem:[%s1410_s20 + $0xc8] sm:$0xff] %v724_v23  ;;  %v641_v24 = vpop.f32.mrf.mxu2  ;;  %v681_v25 = vpop.f32.mrf.mxu3 }
  0xf0   : > { %v642_v26 = vadd.f32 %v1404_v36, %v641_v24  ;;  %v682_v27 = vadd.f32 %v1404_v36, %v681_v25  ;;  %v564_v28 = vpop.f32.mrf.mxu0  ;;  %v604_v29 = vpop.f32.mrf.mxu1 }
  0xf1   : > { %v565_v30 = vadd.f32 %v1404_v36, %v564_v28  ;;  %v605_v31 = vadd.f32 %v1404_v36, %v604_v29 }
  0xf2   : > { %v740_v32 = vmax.f32 %v642_v26, 0.0  ;;  %v756_v33 = vmax.f32 %v682_v27, 0.0 }
  0xf3   : > { %v709_v34 = vmax.f32 %v565_v30, 0.0  ;;  %v725_v35 = vmax.f32 %v605_v31, 0.0 }
  0xf4   : > { %804 = vst [vmem:[%s1410_s20 + $0x148] sm:$0xff] %v740_v32 }
  0xf5   : > { %820 = vst [vmem:[%s1410_s20 + $0x1c8] sm:$0xff] %v756_v33 }
  0xf6   : > { %773 = vst [vmem:[%s1410_s20 + $0x50] sm:$0xff] %v709_v34 }
  0xf7   : > { %789 = vst [vmem:[%s1410_s20 + $0xd0] sm:$0xff] %v725_v35  ;;  %v644_v37 = vpop.f32.mrf.mxu2  ;;  %v684_v38 = vpop.f32.mrf.mxu3 }
  0xf8   : > { %v645_v39 = vadd.f32 %v1404_v36, %v644_v37  ;;  %v685_v40 = vadd.f32 %v1404_v36, %v684_v38  ;;  %v566_v41 = vpop.f32.mrf.mxu0  ;;  %v606_v42 = vpop.f32.mrf.mxu1 }
  0xf9   : > { %v567_v43 = vadd.f32 %v1404_v36, %v566_v41  ;;  %v607_v44 = vadd.f32 %v1404_v36, %v606_v42 }
  0xfa   : > { %v741_v45 = vmax.f32 %v645_v39, 0.0  ;;  %v757_v46 = vmax.f32 %v685_v40, 0.0 }
  0xfb   : > { %v710_v47 = vmax.f32 %v567_v43, 0.0  ;;  %v726_v48 = vmax.f32 %v607_v44, 0.0 }
  0xfc   : > { %805 = vst [vmem:[%s1410_s20 + $0x150] sm:$0xff] %v741_v45 }
  0xfd   : > { %821 = vst [vmem:[%s1410_s20 + $0x1d0] sm:$0xff] %v757_v46 }
  0xfe   : > { %774 = vst [vmem:[%s1410_s20 + $0x58] sm:$0xff] %v710_v47 }
  0xff   : > { %790 = vst [vmem:[%s1410_s20 + $0xd8] sm:$0xff] %v726_v48  ;;  %v646_v49 = vpop.f32.mrf.mxu2  ;;  %v686_v50 = vpop.f32.mrf.mxu3 }
 0x100   : > { %v647_v51 = vadd.f32 %v1404_v36, %v646_v49  ;;  %v687_v52 = vadd.f32 %v1404_v36, %v686_v50  ;;  %v569_v53 = vpop.f32.mrf.mxu0  ;;  %v609_v54 = vpop.f32.mrf.mxu1 }
 0x101   : > { %v570_v55 = vadd.f32 %v1404_v36, %v569_v53  ;;  %v610_v56 = vadd.f32 %v1404_v36, %v609_v54 }
 0x102   : > { %v742_v57 = vmax.f32 %v647_v51, 0.0  ;;  %v758_v58 = vmax.f32 %v687_v52, 0.0 }
 0x103   : > { %v711_v59 = vmax.f32 %v570_v55, 0.0  ;;  %v727_v60 = vmax.f32 %v610_v56, 0.0 }
 0x104   : > { %806 = vst [vmem:[%s1410_s20 + $0x158] sm:$0xff] %v742_v57 }
 0x105   : > { %822 = vst [vmem:[%s1410_s20 + $0x1d8] sm:$0xff] %v758_v58 }
 0x106   : > { %775 = vst [vmem:[%s1410_s20 + $0x60] sm:$0xff] %v711_v59 }
 0x107   : > { %791 = vst [vmem:[%s1410_s20 + $0xe0] sm:$0xff] %v727_v60  ;;  %v649_v61 = vpop.f32.mrf.mxu2  ;;  %v689_v62 = vpop.f32.mrf.mxu3 }
 0x108   : > { %v650_v63 = vadd.f32 %v1404_v36, %v649_v61  ;;  %v690_v0 = vadd.f32 %v1404_v36, %v689_v62  ;;  %v571_v1 = vpop.f32.mrf.mxu0  ;;  %v611_v2 = vpop.f32.mrf.mxu1 }
 0x109   : > { %v572_v3 = vadd.f32 %v1404_v36, %v571_v1  ;;  %v612_v4 = vadd.f32 %v1404_v36, %v611_v2 }
 0x10a   : > { %v743_v5 = vmax.f32 %v650_v63, 0.0  ;;  %v759_v6 = vmax.f32 %v690_v0, 0.0 }
 0x10b   : > { %v712_v7 = vmax.f32 %v572_v3, 0.0  ;;  %v728_v8 = vmax.f32 %v612_v4, 0.0 }
 0x10c   : > { %807 = vst [vmem:[%s1410_s20 + $0x160] sm:$0xff] %v743_v5 }
 0x10d   : > { %823 = vst [vmem:[%s1410_s20 + $0x1e0] sm:$0xff] %v759_v6 }
 0x10e   : > { %776 = vst [vmem:[%s1410_s20 + $0x68] sm:$0xff] %v712_v7 }
 0x10f   : > { %792 = vst [vmem:[%s1410_s20 + $0xe8] sm:$0xff] %v728_v8  ;;  %v651_v9 = vpop.f32.mrf.mxu2  ;;  %v691_v10 = vpop.f32.mrf.mxu3 }
 0x110   : > { %v652_v11 = vadd.f32 %v1404_v36, %v651_v9  ;;  %v692_v12 = vadd.f32 %v1404_v36, %v691_v10  ;;  %v574_v13 = vpop.f32.mrf.mxu0  ;;  %v614_v14 = vpop.f32.mrf.mxu1 }
 0x111   : > { %v575_v15 = vadd.f32 %v1404_v36, %v574_v13  ;;  %v615_v16 = vadd.f32 %v1404_v36, %v614_v14 }
 0x112   : > { %v744_v17 = vmax.f32 %v652_v11, 0.0  ;;  %v760_v18 = vmax.f32 %v692_v12, 0.0 }
 0x113   : > { %v713_v19 = vmax.f32 %v575_v15, 0.0  ;;  %v729_v20 = vmax.f32 %v615_v16, 0.0 }
 0x114   : > { %808 = vst [vmem:[%s1410_s20 + $0x168] sm:$0xff] %v744_v17 }
 0x115   : > { %824 = vst [vmem:[%s1410_s20 + $0x1e8] sm:$0xff] %v760_v18 }
 0x116   : > { %777 = vst [vmem:[%s1410_s20 + $0x70] sm:$0xff] %v713_v19 }
 0x117   : > { %793 = vst [vmem:[%s1410_s20 + $0xf0] sm:$0xff] %v729_v20  ;;  %v654_v21 = vpop.f32.mrf.mxu2  ;;  %v694_v22 = vpop.f32.mrf.mxu3 }
 0x118   : > { %v655_v23 = vadd.f32 %v1404_v36, %v654_v21  ;;  %v695_v24 = vadd.f32 %v1404_v36, %v694_v22  ;;  %v576_v25 = vpop.f32.mrf.mxu0  ;;  %v616_v26 = vpop.f32.mrf.mxu1 }
 0x119   : > { %v577_v27 = vadd.f32 %v1404_v36, %v576_v25  ;;  %v617_v28 = vadd.f32 %v1404_v36, %v616_v26 }
 0x11a   : > { %v745_v29 = vmax.f32 %v655_v23, 0.0  ;;  %v761_v30 = vmax.f32 %v695_v24, 0.0 }
 0x11b   : > { %v714_v31 = vmax.f32 %v577_v27, 0.0  ;;  %v730_v32 = vmax.f32 %v617_v28, 0.0 }
 0x11c   : > { %809 = vst [vmem:[%s1410_s20 + $0x170] sm:$0xff] %v745_v29 }
 0x11d   : > { %825 = vst [vmem:[%s1410_s20 + $0x1f0] sm:$0xff] %v761_v30 }
 0x11e   : > { %778 = vst [vmem:[%s1410_s20 + $0x78] sm:$0xff] %v714_v31 }
 0x11f   : > { %794 = vst [vmem:[%s1410_s20 + $0xf8] sm:$0xff] %v730_v32  ;;  %v656_v33 = vpop.f32.mrf.mxu2  ;;  %v696_v34 = vpop.f32.mrf.mxu3 }
 0x120   : > { %v657_v35 = vadd.f32 %v1404_v36, %v656_v33  ;;  %v697_v37 = vadd.f32 %v1404_v36, %v696_v34 }
 0x122   : > { %v746_v38 = vmax.f32 %v657_v35, 0.0  ;;  %v762_v39 = vmax.f32 %v697_v37, 0.0 }
 0x124   : > { %810 = vst [vmem:[%s1410_s20 + $0x178] sm:$0xff] %v746_v38 }
 0x125   : > { %826 = vst [vmem:[%s1410_s20 + $0x1f8] sm:$0xff] %v762_v39 }
 0x126   : > { %1211 = shalt.err (!%p1208_p3)
}
 0x127   : > { %s1248_s10 = smov 128   ;;  %s1249_s11 = smov 8  }
 0x128   : > { %1142 = dma.vmem_to_hbm [thread:$0]  (%p1308_p5), %s841_s28, 8192, %s843_s16, %s828_s29, %s1248_s10, %s1248_s10, %s1249_s11  }
 0x129 PF: > { %p1148_p4 = scmp.ge.s32.totalorder %s1246_s15, 2  ;;  %s857_s17 = sand.u32 1, %s1234_s12  }
 0x12a   : > { %s858_s19 = scalar_lea.sflag [#allocation3], %s857_s17 }
 0x12b   : > { %p1145_p7 = pnand %p1148_p4, %p1312_p6 }
 0x12d   : > { %p1146_p8 = pneg %p1145_p7 }
 0x12f   : > { %1229 = dma.done.wait (%p1146_p8), %s858_s19, 8192  }
 0x130   : > { %1231 = vsyncadd (%p1146_p8), %s858_s19, 4294959104  ;;  %p13_p9 = scmp.ge.s32.totalorder %s1295_s18, 4   ;;  %s1578_s12 = smov %s1238_s13 }
 0x131   : > { %s1579_s13 = smov %s1242_s14  ;;  %s1580_s14 = smov %s1306_s21 }
 0x132   : > { %s1581_s15 = smov %s1295_s18  ;;  %15 = sbr.rel (!%p13_p9) target bundleno = 3 (0x3), region = 67 }
 0x137   :  { %864 = vsyncpa [#allocation3], 1 }
 0x138   :  { %866 = vsyncpa [#allocation3 + $0x1], 1 }

</bundles_post_ra>
